<compile_context>
chip_gen: v5e
topology: v5e:2x2
jax: 0.10.0
libtpu: 0.0.40
codegen_flags: <defaults>
</compile_context>

<pallas_src>
import functools

import jax
import jax.numpy as jnp
from jax import lax
from jax.experimental import pallas as pl
from jax.experimental.pallas import tpu as pltpu


def _triplet_kernel(im_strip_ref, s_strip_ref, s_cols_ref, im_cols_ref,
                    out_ref, thr_ref, *, margin, tn, b_actual, masked):
    j = pl.program_id(1)

    im_strip = im_strip_ref[...]                     # (TM, D), native dtype
    s_strip = s_strip_ref[...]                       # (TM, D), native dtype

    @pl.when(j == 0)
    def _():
        # thr[r] = <im_r, s_r> - margin, reused by every column tile of strip i.
        diag = jnp.sum(im_strip.astype(jnp.float32) * s_strip.astype(jnp.float32),
                       axis=1, keepdims=True)        # (TM, 1) f32
        thr_ref[...] = diag - margin
        # Diagonal hinge terms each contribute exactly relu(margin + d - d) =
        # margin; subtract the two per-row diagonal terms algebraically instead
        # of building an eye mask.
        out_ref[...] = jnp.full(out_ref.shape, -2.0 * margin, out_ref.dtype)

    thr = thr_ref[...]                               # (TM, 1) f32

    if masked:
        # Batch was zero-padded in the wrapper: drop padded columns here
        # (padded rows are dropped by slicing the output in the wrapper).
        col_ids = j * tn + lax.broadcasted_iota(jnp.int32, (1, tn), 1)
        col_valid = col_ids < b_actual               # (1, TN) bool
    else:
        col_valid = None

    # Contract the last dim of both operands (A @ B.T, flash-attention style);
    # MXU in the input dtype, f32 accumulation.
    dims = (((1,), (1,)), ((), ()))

    def hinge_row_sums(lhs, rhs_ref):
        scores = lax.dot_general(lhs, rhs_ref[...], dims,
                                 preferred_element_type=jnp.float32)  # (TM, TN)
        h = jnp.maximum(scores - thr, 0.0)
        if col_valid is not None:
            h = jnp.where(col_valid, h, 0.0)
        return jnp.sum(h, axis=-1, keepdims=True)    # lane-direction reduce only

    # Sequence the two hinge contributions: only one (TM, TN) f32 temporary is
    # live at a time (VMEM / vreg pressure, esp. v7x's 64 MiB per-TC VMEM).
    out_ref[...] += hinge_row_sums(im_strip, s_cols_ref)   # cost_s rows
    out_ref[...] += hinge_row_sums(s_strip, im_cols_ref)   # cost_im (scores.T rows)


def _vmem_limit_bytes():
    """Generation-aware VMEM budget: ~75% of physical, capped at 100 MiB
    (-> ~96 MiB on v5e/v6e's 128 MiB, ~48 MiB on v7x's 64 MiB per TC)."""
    phys = 64 * 1024 * 1024
    try:
        phys = int(pltpu.get_tpu_info().vmem_capacity_bytes)
    except Exception:
        pass
    return min(phys - phys // 4, 100 * 1024 * 1024)


_TM_CANDIDATES = (256, 128, 64, 32, 16, 8)


def _choose_tiles(B, D, itemsize, vmem_budget):
    """Pick (B_pad, TM, TN): TM divides B_pad with bounded padding waste;
    TN is the full padded batch if the double-buffered column operands fit
    the VMEM budget, else the largest fitting multiple of 128."""
    tm, b_pad = 8, -(-B // 8) * 8
    for cand in _TM_CANDIDATES:
        pad = -(-B // cand) * cand
        if (pad - B) * 4 <= max(B, 8) or cand == _TM_CANDIDATES[-1]:
            tm, b_pad = cand, pad
            break
    full_cost = 2 * 2 * b_pad * D * itemsize          # 2 arrays x 2 buffers
    tn = b_pad
    if full_cost > vmem_budget // 2:
        for cand in (2048, 1024, 512, 256, 128):
            if b_pad % cand == 0 and 2 * 2 * cand * D * itemsize <= vmem_budget // 2:
                tn = cand
                break
    return b_pad, tm, tn


def triplet_loss(im, s, margin=0.2):
    """Pallas implementation of Triplet(margin).forward(im, s), cosine sim."""
    assert im.ndim == 2 and s.ndim == 2 and im.shape == s.shape
    assert im.dtype == s.dtype
    assert margin >= 0.0  # required for the algebraic diagonal removal
    B, D = im.shape

    vmem_budget = _vmem_limit_bytes()
    b_pad, tm, tn = _choose_tiles(B, D, im.dtype.itemsize, vmem_budget)
    # TODO(synk): very large D would additionally need a D-axis tile.

    if b_pad != B:
        im = jnp.pad(im, ((0, b_pad - B), (0, 0)))
        s = jnp.pad(s, ((0, b_pad - B), (0, 0)))

    num_strips = b_pad // tm
    num_cols = b_pad // tn

    kernel = functools.partial(_triplet_kernel, margin=float(margin),
                               tn=tn, b_actual=B, masked=(b_pad != B))

    out = pl.pallas_call(
        kernel,
        out_shape=jax.ShapeDtypeStruct((b_pad, 1), jnp.float32),
        grid_spec=pltpu.PrefetchScalarGridSpec(
            num_scalar_prefetch=0,
            grid=(num_strips, num_cols),           # reduction (column) axis last
            in_specs=[
                pl.BlockSpec((tm, D), lambda i, j: (i, 0)),   # im row strip
                pl.BlockSpec((tm, D), lambda i, j: (i, 0)),   # s  row strip
                pl.BlockSpec((tn, D), lambda i, j: (j, 0)),   # s  column block
                pl.BlockSpec((tn, D), lambda i, j: (j, 0)),   # im column block
            ],
            # Per-strip partial row sums; resident across the column axis.
            out_specs=pl.BlockSpec((tm, 1), lambda i, j: (i, 0)),
            scratch_shapes=[pltpu.VMEM((tm, 1), jnp.float32)],  # thr cache
        ),
        compiler_params=pltpu.CompilerParams(
            # Strip axis is embarrassingly parallel (disjoint output blocks);
            # the column axis accumulates into the resident output block.
            dimension_semantics=("parallel", "arbitrary"),
            vmem_limit_bytes=vmem_budget,
        ),
    )(im, s, s, im)

    # Tiny final reduction (and padded-row drop) in the wrapper.
    return jnp.sum(out[:B, 0])


def _reference_triplet(im, s, margin=0.2):
    scores = im @ s.T
    diag = jnp.diag(scores).reshape(-1, 1)
    cost_s = jnp.maximum(margin + scores - diag, 0.0)
    cost_im = jnp.maximum(margin + scores - diag.T, 0.0)
    eye = jnp.eye(scores.shape[0], dtype=bool)
    cost_s = jnp.where(eye, 0.0, cost_s)
    cost_im = jnp.where(eye, 0.0, cost_im)
    return jnp.sum(cost_s) + jnp.sum(cost_im)


if __name__ == "__main__":
    key = jax.random.PRNGKey(0)

    # Small aligned case: batch=8, embedding dim=32.
    k_im, k_s = jax.random.split(key)
    B, D = 8, 32
    im = jax.random.normal(k_im, (B, D), dtype=jnp.float32)
    s = jax.random.normal(k_s, (B, D), dtype=jnp.float32)
    out = jax.block_until_ready(triplet_loss(im, s, margin=0.2))
    ref = jax.block_until_ready(_reference_triplet(im, s, margin=0.2))
    assert jnp.allclose(out, ref, rtol=1e-4, atol=1e-4), (out, ref)

    # Unaligned batch exercising the padding + column-mask path: batch=12.
    k_im2, k_s2 = jax.random.split(k_im)
    B2 = 12
    im2 = jax.random.normal(k_im2, (B2, D), dtype=jnp.float32)
    s2 = jax.random.normal(k_s2, (B2, D), dtype=jnp.float32)
    out2 = jax.block_until_ready(triplet_loss(im2, s2, margin=0.2))
    ref2 = jax.block_until_ready(_reference_triplet(im2, s2, margin=0.2))
    assert jnp.allclose(out2, ref2, rtol=1e-4, atol=1e-4), (out2, ref2)

    print("KERNEL_OK")
</pallas_src>

<mosaic_0001>
module attributes {stable_mosaic.version = 11 : i64} {
  func.func @_triplet_kernel(%arg0: i32, %arg1: i32, %arg2: memref<8x32xf32, #tpu.memory_space<vmem>>, %arg3: memref<8x32xf32, #tpu.memory_space<vmem>>, %arg4: memref<8x32xf32, #tpu.memory_space<vmem>>, %arg5: memref<8x32xf32, #tpu.memory_space<vmem>>, %arg6: memref<8x1xf32, #tpu.memory_space<vmem>>, %arg7: memref<8x1xf32, #tpu.memory_space<vmem>>) attributes {dimension_semantics = [#tpu.dimension_semantics<parallel>, #tpu.dimension_semantics<arbitrary>], iteration_bounds = array<i64: 1, 1>, scalar_prefetch = 0 : i64, scratch_operands = 1 : i64, tpu.core_type = #tpu.core_type<tc>, window_params = [{transform_indices = @transform_0, window_bounds = array<i64: 8, 32>}, {transform_indices = @transform_1, window_bounds = array<i64: 8, 32>}, {transform_indices = @transform_2, window_bounds = array<i64: 8, 32>}, {transform_indices = @transform_3, window_bounds = array<i64: 8, 32>}, {transform_indices = @transform_4, window_bounds = array<i64: 8, 1>}]} {
    %c0 = arith.constant 0 : index
    %c0_0 = arith.constant 0 : index
    %0 = vector.load %arg2[%c0, %c0_0] : memref<8x32xf32, #tpu.memory_space<vmem>>, vector<8x32xf32>
    %c0_1 = arith.constant 0 : index
    %c0_2 = arith.constant 0 : index
    %1 = vector.load %arg3[%c0_1, %c0_2] : memref<8x32xf32, #tpu.memory_space<vmem>>, vector<8x32xf32>
    %c0_i32 = arith.constant 0 : i32
    %2 = arith.cmpi eq, %arg1, %c0_i32 : i32
    %3 = arith.extui %2 : i1 to i32
    %c0_i32_3 = arith.constant 0 : i32
    %4 = arith.cmpi ne, %3, %c0_i32_3 : i32
    scf.if %4 {
      %28 = arith.mulf %0, %1 : vector<8x32xf32>
      %cst_23 = arith.constant dense<0.000000e+00> : vector<8xf32>
      %29 = vector.multi_reduction <add>, %28, %cst_23 [1] : vector<8x32xf32> to vector<8xf32>
      %30 = vector.shape_cast %29 : vector<8xf32> to vector<8x1xf32>
      %cst_24 = arith.constant 2.000000e-01 : f32
      %31 = vector.broadcast %cst_24 : f32 to vector<8x1xf32>
      %32 = arith.subf %30, %31 : vector<8x1xf32>
      %c0_25 = arith.constant 0 : index
      %c0_26 = arith.constant 0 : index
      %33 = vector.load %arg7[%c0_25, %c0_26] : memref<8x1xf32, #tpu.memory_space<vmem>>, vector<8x1xf32>
      tpu.vector_store %arg7[%c0_25, %c0_26], %32 {strides = array<i32>} : memref<8x1xf32, #tpu.memory_space<vmem>>, vector<8x1xf32>,
      %cst_27 = arith.constant -4.000000e-01 : f32
      %34 = vector.broadcast %cst_27 : f32 to vector<8x1xf32>
      %c0_28 = arith.constant 0 : index
      %c0_29 = arith.constant 0 : index
      %35 = vector.load %arg6[%c0_28, %c0_29] : memref<8x1xf32, #tpu.memory_space<vmem>>, vector<8x1xf32>
      tpu.vector_store %arg6[%c0_28, %c0_29], %34 {strides = array<i32>} : memref<8x1xf32, #tpu.memory_space<vmem>>, vector<8x1xf32>,
    } else {
    }
    %c0_4 = arith.constant 0 : index
    %c0_5 = arith.constant 0 : index
    %5 = vector.load %arg7[%c0_4, %c0_5] : memref<8x1xf32, #tpu.memory_space<vmem>>, vector<8x1xf32>
    %c0_6 = arith.constant 0 : index
    %c0_7 = arith.constant 0 : index
    %6 = vector.load %arg6[%c0_6, %c0_7] : memref<8x1xf32, #tpu.memory_space<vmem>>, vector<8x1xf32>
    %c0_8 = arith.constant 0 : index
    %c0_9 = arith.constant 0 : index
    %7 = vector.load %arg4[%c0_8, %c0_9] : memref<8x32xf32, #tpu.memory_space<vmem>>, vector<8x32xf32>
    %cst = arith.constant dense<0.000000e+00> : vector<8x8xf32>
    %8 = tpu.matmul %0, %7, %cst {dimension_numbers = #tpu.dot_dimension_numbers<[1], [1], [0], [0], [0, 0, 1, 0], [], []>} : vector<8x32xf32>, vector<8x32xf32>, vector<8x8xf32> -> vector<8x8xf32>
    %9 = vector.broadcast %5 : vector<8x1xf32> to vector<8x8xf32>
    %10 = arith.subf %8, %9 : vector<8x8xf32>
    %cst_10 = arith.constant 0.000000e+00 : f32
    %11 = vector.broadcast %cst_10 : f32 to vector<8x8xf32>
    %12 = arith.maximumf %10, %11 : vector<8x8xf32>
    %cst_11 = arith.constant dense<0.000000e+00> : vector<8xf32>
    %13 = vector.multi_reduction <add>, %12, %cst_11 [1] : vector<8x8xf32> to vector<8xf32>
    %14 = vector.shape_cast %13 : vector<8xf32> to vector<8x1xf32>
    %15 = arith.addf %6, %14 : vector<8x1xf32>
    %c0_12 = arith.constant 0 : index
    %c0_13 = arith.constant 0 : index
    %16 = vector.load %arg6[%c0_12, %c0_13] : memref<8x1xf32, #tpu.memory_space<vmem>>, vector<8x1xf32>
    tpu.vector_store %arg6[%c0_12, %c0_13], %15 {strides = array<i32>} : memref<8x1xf32, #tpu.memory_space<vmem>>, vector<8x1xf32>,
    %c0_14 = arith.constant 0 : index
    %c0_15 = arith.constant 0 : index
    %17 = vector.load %arg6[%c0_14, %c0_15] : memref<8x1xf32, #tpu.memory_space<vmem>>, vector<8x1xf32>
    %c0_16 = arith.constant 0 : index
    %c0_17 = arith.constant 0 : index
    %18 = vector.load %arg5[%c0_16, %c0_17] : memref<8x32xf32, #tpu.memory_space<vmem>>, vector<8x32xf32>
    %cst_18 = arith.constant dense<0.000000e+00> : vector<8x8xf32>
    %19 = tpu.matmul %1, %18, %cst_18 {dimension_numbers = #tpu.dot_dimension_numbers<[1], [1], [0], [0], [0, 0, 1, 0], [], []>} : vector<8x32xf32>, vector<8x32xf32>, vector<8x8xf32> -> vector<8x8xf32>
    %20 = vector.broadcast %5 : vector<8x1xf32> to vector<8x8xf32>
    %21 = arith.subf %19, %20 : vector<8x8xf32>
    %cst_19 = arith.constant 0.000000e+00 : f32
    %22 = vector.broadcast %cst_19 : f32 to vector<8x8xf32>
    %23 = arith.maximumf %21, %22 : vector<8x8xf32>
    %cst_20 = arith.constant dense<0.000000e+00> : vector<8xf32>
    %24 = vector.multi_reduction <add>, %23, %cst_20 [1] : vector<8x8xf32> to vector<8xf32>
    %25 = vector.shape_cast %24 : vector<8xf32> to vector<8x1xf32>
    %26 = arith.addf %17, %25 : vector<8x1xf32>
    %c0_21 = arith.constant 0 : index
    %c0_22 = arith.constant 0 : index
    %27 = vector.load %arg6[%c0_21, %c0_22] : memref<8x1xf32, #tpu.memory_space<vmem>>, vector<8x1xf32>
    tpu.vector_store %arg6[%c0_21, %c0_22], %26 {strides = array<i32>} : memref<8x1xf32, #tpu.memory_space<vmem>>, vector<8x1xf32>,
    return
  }
  func.func @transform_0(%arg0: i32, %arg1: i32) -> (i32, i32) {
    %c0_i32 = arith.constant 0 : i32
    %c0_i32_0 = arith.constant 0 : i32
    return %arg0, %c0_i32 : i32, i32
  }
  func.func @transform_1(%arg0: i32, %arg1: i32) -> (i32, i32) {
    %c0_i32 = arith.constant 0 : i32
    %c0_i32_0 = arith.constant 0 : i32
    return %arg0, %c0_i32 : i32, i32
  }
  func.func @transform_2(%arg0: i32, %arg1: i32) -> (i32, i32) {
    %c0_i32 = arith.constant 0 : i32
    %c0_i32_0 = arith.constant 0 : i32
    return %arg1, %c0_i32 : i32, i32
  }
  func.func @transform_3(%arg0: i32, %arg1: i32) -> (i32, i32) {
    %c0_i32 = arith.constant 0 : i32
    %c0_i32_0 = arith.constant 0 : i32
    return %arg1, %c0_i32 : i32, i32
  }
  func.func @transform_4(%arg0: i32, %arg1: i32) -> (i32, i32) {
    %c0_i32 = arith.constant 0 : i32
    %c0_i32_0 = arith.constant 0 : i32
    return %arg0, %c0_i32 : i32, i32
  }
}

</mosaic_0001>

<bundles_post_ra>
// kernel: tpu_custom_call.1
= control target key start
LH: loop header
LB: loop body
LE: loop exit
PB: predicated region body
PF: predicated region fallthrough
CT: control target
= control target key end

     0   :  { %9 = vsyncpa [#allocation4], 0  ;;  %s349_s0 = inlined_call_operand.hbm [shape: f32[8,32], index: 0, kind: input, shape index: {}]   ;;  %s350_s1 = inlined_call_operand.hbm [shape: f32[8,32], index: 1, kind: input, shape index: {}]   ;;  %s351_s2 = inlined_call_operand.hbm [shape: f32[8,32], index: 2, kind: input, shape index: {}]   ;;  %s352_s3 = inlined_call_operand.hbm [shape: f32[8,32], index: 3, kind: input, shape index: {}]   ;;  %s353_s4 = inlined_call_operand.vmem [shape: f32[8,1], index: 4, kind: output, shape index: {}]  }
   0x1   :  { %10 = vsyncpa [#allocation6], 0  ;;  %s28_s17 = sshll.u32 %s350_s1, 4  ;;  %s29_s17 = int_to_ptr.hbm [resolvable:$true] %s28_s17 }
   0x2   :  { %11 = vsyncpa [#allocation9], 0  ;;  %s287_s18 = smov [#allocation5]   ;;  %s17_s22 = sshll.u32 %s349_s0, 4  ;;  %s18_s22 = int_to_ptr.hbm [resolvable:$true] %s17_s22 }
   0x3   :  { %s30_s19 = sshll.u32 %s287_s18, 4  ;;  %s288_s23 = smov [#allocation3]   ;;  %s31_s19 = int_to_ptr.vmem [resolvable:$true] %s30_s19 }
   0x4   :  { %33 = dma.hbm_to_vmem [thread:$0]  %s29_s17, 128, %s31_s19, [#allocation6]  }
   0x5   :  { %s19_s24 = sshll.u32 %s288_s23, 4  ;;  %s39_s27 = sshll.u32 %s351_s2, 4  ;;  %s20_s24 = int_to_ptr.vmem [resolvable:$true] %s19_s24  ;;  %s40_s27 = int_to_ptr.hbm [resolvable:$true] %s39_s27 }
   0x6   :  { %22 = dma.hbm_to_vmem [thread:$0]  %s18_s22, 128, %s20_s24, [#allocation4]  }
   0x7   :  { %s50_s29 = sshll.u32 %s352_s3, 4  ;;  %s289_s30 = smov [#allocation7]   ;;  %s51_s29 = int_to_ptr.hbm [resolvable:$true] %s50_s29 }
   0x8   :  { %s41_s5 = sshll.u32 %s289_s30, 4  ;;  %s290_s0 = smov [#allocation8]   ;;  %s42_s5 = int_to_ptr.vmem [resolvable:$true] %s41_s5 }
   0x9   :  { %44 = dma.hbm_to_vmem [thread:$0]  %s40_s27, 128, %s42_s5, [#allocation6]  }
   0xa   :  { %s52_s6 = sshll.u32 %s290_s0, 4  ;;  %s53_s6 = int_to_ptr.vmem [resolvable:$true] %s52_s6 }
   0xb   :  { %55 = dma.hbm_to_vmem [thread:$0]  %s51_s29, 128, %s53_s6, [#allocation9]  }
   0xc   :  { %281 = dma.done.wait [#allocation4], 128  }
   0xd   :  { %282 = vsyncadd [#allocation4], 4294967168 }
   0xe   :  { %283 = dma.done.wait [#allocation6], 256  }
   0xf   :  { %284 = vsyncadd [#allocation6], 4294967040 }
  0x10   :  { %285 = dma.done.wait [#allocation9], 128  }
  0x11   :  { %286 = vsyncadd [#allocation9], 4294967168  ;;  %vm84_vm0 = vcmask 7168   ;;  %v291_v0 = vmov -0.4   ;;  %v72_v1 = vld [vmem:[#allocation3] sm:$0xff] }
  0x12   :  { %86 = vst.msk [vmem:[%s353_s4] sm:$0xff] %vm84_vm0, %v291_v0  ;;  %v73_v2 = vld [vmem:[#allocation5] sm:$0xff]  ;;  %vm79_vm1 = vcmask 261120   ;;  %v89_v3 = vld [vmem:[#allocation7] sm:$0xff]  ;;  %v132_v5 = vld [vmem:[#allocation8] sm:$0xff]  ;;  %v292_v7 = vmov 0  }
  0x13   :  { %v78_v4 = vmul.f32 %v73_v2, %v72_v1  ;;  %174 = vmatpush.xpose.msk.msra.mxu0 %vm79_vm1, %v89_v3  ;;  %176 = vmatpush.xpose.msk.msra.mxu1 %vm79_vm1, %v132_v5  ;;  %vm124_vm2 = vcmask 64512  }
  0x14   :  { %184 = vset.pattern.permute.xlu0 %v292_v7 }
  0x15   :  { %v80_v6 = vsel %vm79_vm1, %v78_v4, 0.0 }
  0x16   :  { %81 = vadd.xlane.f32.xlu0 %v80_v6  ;;  %175 = vmatmul.msk.f32.vlgmr.msra.gmra.mxu0 %vm79_vm1, %v72_v1 }
  0x17   :  { %177 = vmatmul.msk.f32.vlgmr.msra.gmra.mxu1 %vm79_vm1, %v73_v2 }
  0x19   :  { %v88_v20 = vld [vmem:[%s353_s4] sm:$0xff] }
  0x89   :  { %v82_v8 = vpop.xlane.xlu0 %81 }
  0x8a   :  { %v173_v9 = vadd.f32 -0.2, %v82_v8 }
  0x8c   :  { %85 = vst.msk [vmem:[#allocation2] sm:$0xff] %vm84_vm0, %v173_v9 }
  0x93   :  { %v87_v10 = vld [vmem:[#allocation2] sm:$0xff]  ;;  %v114_v11 = vpop.f32.mrf.mxu0 }
  0x94   :  { %119 = vperm.xlu0 %184, %v87_v10   ;;  %v156_v14 = vpop.f32.mrf.mxu1 }
 0x106   :  { %v120_v12 = vpop.permute.xlu0 %119 }
 0x107   :  { %v122_v13 = vsub.f32 %v114_v11, %v120_v12  ;;  %v159_v16 = vsub.f32 %v156_v14, %v120_v12 }
 0x109   :  { %v123_v15 = vmax.f32 %v122_v13, 0.0  ;;  %v160_v18 = vmax.f32 %v159_v16, 0.0 }
 0x10b   :  { %v125_v17 = vsel %vm124_vm2, %v123_v15, 0.0  ;;  %v161_v19 = vsel %vm124_vm2, %v160_v18, 0.0 }
 0x10c   :  { %126 = vadd.xlane.f32.xlu1 %v125_v17 }
 0x114   :  { %162 = vadd.xlane.f32.xlu1 %v161_v19 }
 0x17f   :  { %v127_v21 = vpop.xlane.xlu1 %126 }
 0x180   :  { %v128_v22 = vadd.f32 %v127_v21, %v88_v20 }
 0x182   :  { %130 = vst.msk [vmem:[%s353_s4] sm:$0xff] %vm84_vm0, %v128_v22 }
 0x187   :  { %v163_v24 = vpop.xlane.xlu1 %162 }
 0x189   :  { %v131_v23 = vld [vmem:[%s353_s4] sm:$0xff] }
 0x18a   :  { %v164_v25 = vadd.f32 %v163_v24, %v131_v23 }
 0x18c   :  { %165 = vst.msk [vmem:[%s353_s4] sm:$0xff] %vm84_vm0, %v164_v25 }
 0x18d   :  { %170 = vsyncpa [#allocation4], 1 }
 0x18e   :  { %171 = vsyncpa [#allocation6], 1 }
 0x18f   :  { %172 = vsyncpa [#allocation9], 1 }

</bundles_post_ra>
